<compile_context>
chip_gen: v6e
topology: v6e:2x2x1
jax: 0.10.0
libtpu: 0.0.40
codegen_flags: <defaults>
</compile_context>

<pallas_src>
import jax
import jax.numpy as jnp
from jax import lax
from jax.experimental import pallas as pl
from jax.experimental.pallas import tpu as pltpu

_EPS = 1e-5  # PyTorch nn.LayerNorm default


def _head_kernel(frames_ref, w_feat_ref, ln1_gr_ref, w1r_ref,
                 mu_coef_ref, bias_const_ref, ln2_g_ref, ln2_b_ref,
                 w2_ref, b2_ref, out_ref):
    B = frames_ref.shape[0]
    H = w_feat_ref.shape[1]

    # --- stand-in HuBERT encoder + pooling --------------------------------
    # mean over T commutes with the linear frame projection: pool first, then
    # a single (B,F)x(F,H) bf16 MXU matmul with f32 accumulation.
    pooled_frames = jnp.mean(frames_ref[...], axis=1)                    # (B, F) f32
    pooled_hubert = jnp.dot(pooled_frames.astype(jnp.bfloat16),
                            w_feat_ref[...],
                            preferred_element_type=jnp.float32)          # (B, H) f32

    # --- LayerNorm([B, 2H]) stats over concat([zeros, pooled_hubert]) ------
    # The zeroed BERT half is never materialized; it only shifts the stats.
    n1 = B * 2 * H
    mu1 = jnp.sum(pooled_hubert) / n1
    d1 = pooled_hubert - mu1
    var1 = (jnp.sum(d1 * d1) + (B * H) * mu1 * mu1) / n1
    inv1 = lax.rsqrt(var1 + _EPS)
    # dropout1: identity (eval mode)

    # --- Linear(2H -> 32) + ReLU --------------------------------------------
    # Parameter-only products (ln1_gl@w1l, ln1_bl@w1l, ln1_gr@w1r, ln1_br@w1r)
    # were folded offline into mu_coef / bias_const; only the data-dependent
    # (pooled_hubert * ln1_gr) @ w1r remains on the MXU.
    z = pooled_hubert * ln1_gr_ref[...]                                  # (B, H)
    hz = jnp.dot(z, w1r_ref[...], preferred_element_type=jnp.float32)    # (B, 32)
    h = inv1 * hz - (mu1 * inv1) * mu_coef_ref[...] + bias_const_ref[...]
    h = jnp.maximum(h, 0.0)
    # dropout2: identity (eval mode)

    # --- LayerNorm([B, 32]) --------------------------------------------------
    n2 = h.size
    mu2 = jnp.sum(h) / n2
    d2 = h - mu2
    var2 = jnp.sum(d2 * d2) / n2
    inv2 = lax.rsqrt(var2 + _EPS)
    hn = d2 * inv2 * ln2_g_ref[...] + ln2_b_ref[...]                     # (B, 32)

    # --- Linear(32 -> 1) as a lane reduction (no N=1 MXU tail) ---------------
    y = jnp.sum(hn * w2_ref[...], axis=-1, keepdims=True) + b2_ref[0, 0] # (B, 1)
    out_ref[...] = jnp.tanh(y) * 2.5


def pack_params(params):
    """One-time parameter repacking (keep OUT of the per-call hot path)."""
    F, H = params["w_feat"].shape
    hi = lax.Precision.HIGHEST
    w1l, w1r = params["w1"][:H], params["w1"][H:]                 # (H,32) each
    ln1_gl, ln1_gr = params["ln1_g"][:, :H], params["ln1_g"][:, H:]
    ln1_bl, ln1_br = params["ln1_b"][:, :H], params["ln1_b"][:, H:]
    gl1 = jnp.dot(ln1_gl, w1l, precision=hi)                      # (B,32)
    gr1 = jnp.dot(ln1_gr, w1r, precision=hi)
    bl1 = jnp.dot(ln1_bl, w1l, precision=hi)
    br1 = jnp.dot(ln1_br, w1r, precision=hi)
    return {
        "w_feat_bf16": params["w_feat"].astype(jnp.bfloat16),     # (F, H) bf16
        "ln1_gr": ln1_gr,                                         # (B, H) f32
        "w1r": w1r,                                               # (H, 32) f32, unpadded
        "mu_coef": gl1 + gr1,                                     # (B, 32)
        "bias_const": bl1 + br1 + params["b1"],                   # (B, 32)
        "ln2_g": params["ln2_g"],                                 # (B, 32)
        "ln2_b": params["ln2_b"],                                 # (B, 32)
        "w2_row": params["w2"].T,                                 # (1, 32)
        "b2": params["b2"],                                       # (1, 1) -> SMEM
    }


@jax.jit
def multimodel_forward(input_values, input_id, mask, packed):
    """Mirrors CustomMultiModelSimplePooledText.forward.

    input_id / mask feed the (untranslated) BERT backbone whose pooled output
    the reference forward() immediately zeroes, so they cannot affect the
    result and are dropped here.
    """
    del input_id, mask  # BERT pooled output is replaced by zeros in the reference.

    B = input_values.shape[0]
    F, H = packed["w_feat_bf16"].shape
    T = input_values.shape[1] // F
    frames = input_values.reshape(B, T, F).astype(jnp.float32)

    operands = (frames, packed["w_feat_bf16"], packed["ln1_gr"], packed["w1r"],
                packed["mu_coef"], packed["bias_const"],
                packed["ln2_g"], packed["ln2_b"], packed["w2_row"], packed["b2"])

    vmem_spec = pl.BlockSpec(memory_space=pltpu.MemorySpace.VMEM)
    smem_spec = pl.BlockSpec(memory_space=pltpu.MemorySpace.SMEM)
    bytes_accessed = sum(int(x.size) * x.dtype.itemsize for x in operands) + B * 4
    cost = pl.CostEstimate(
        flops=2 * B * F * H + 2 * B * H * 32 + 2 * B * 32,
        transcendentals=B + 2,                 # tanh(B) + 2 rsqrt
        bytes_accessed=bytes_accessed)

    # Grid-less call: every operand fits comfortably in VMEM (< 0.5 MiB total).
    return pl.pallas_call(
        _head_kernel,
        out_shape=jax.ShapeDtypeStruct((B, 1), jnp.float32),
        in_specs=[vmem_spec] * 9 + [smem_spec],
        out_specs=vmem_spec,
        cost_estimate=cost,
    )(*operands)


# ----------------------------- references ---------------------------------
def _head_reference(pooled_hubert, params):
    """Pure-JAX f32 reference of everything after the HuBERT pooling."""
    hi = lax.Precision.HIGHEST
    concat = jnp.concatenate([jnp.zeros_like(pooled_hubert), pooled_hubert], axis=1)
    mu1, var1 = jnp.mean(concat), jnp.var(concat)
    x = (concat - mu1) / jnp.sqrt(var1 + _EPS) * params["ln1_g"] + params["ln1_b"]
    h = jnp.maximum(jnp.dot(x, params["w1"], precision=hi) + params["b1"], 0.0)
    mu2, var2 = jnp.mean(h), jnp.var(h)
    h = (h - mu2) / jnp.sqrt(var2 + _EPS) * params["ln2_g"] + params["ln2_b"]
    return jnp.tanh(jnp.dot(h, params["w2"], precision=hi) + params["b2"]) * 2.5


def _reference_forward(input_values, params, *, matmul_dtype=jnp.float32,
                       mean_first=False):
    B = input_values.shape[0]
    F, H = params["w_feat"].shape
    T = input_values.shape[1] // F
    frames = input_values.reshape(B, T, F)
    w = params["w_feat"].astype(matmul_dtype)
    if mean_first:
        pooled = jnp.mean(frames, axis=1).astype(matmul_dtype)
        pooled_hubert = jnp.dot(pooled, w, preferred_element_type=jnp.float32)
    else:
        hidden = jnp.einsum("btf,fh->bth", frames.astype(matmul_dtype), w,
                            preferred_element_type=jnp.float32)
        pooled_hubert = jnp.mean(hidden, axis=1)
    return _head_reference(pooled_hubert, params)


if __name__ == "__main__":
    B, T, F, H = 4, 8, 128, 768  # B=4 is forced by LayerNorm([4, ...]) in __init__

    key = jax.random.PRNGKey(0)
    ks = jax.random.split(key, 12)

    # Forward inputs (input_id / mask only feed the zeroed-out BERT branch).
    input_values = jax.random.normal(ks[0], (B, T * F), jnp.float32)
    input_id = jax.random.randint(ks[1], (B, 16), 0, 1000, dtype=jnp.int32)
    mask = jnp.ones((B, 16), jnp.int32)

    # Deterministic parameter init (shapes from the module's __init__).
    params = {
        "w_feat": 0.02 * jax.random.normal(ks[2], (F, H), jnp.float32),
        "ln1_g": 1.0 + 0.05 * jax.random.normal(ks[3], (B, 2 * H), jnp.float32),
        "ln1_b": 0.05 * jax.random.normal(ks[4], (B, 2 * H), jnp.float32),
        "w1": 0.02 * jax.random.normal(ks[5], (2 * H, 32), jnp.float32),
        "b1": 0.01 * jax.random.normal(ks[6], (1, 32), jnp.float32),
        "ln2_g": 1.0 + 0.05 * jax.random.normal(ks[7], (B, 32), jnp.float32),
        "ln2_b": 0.05 * jax.random.normal(ks[8], (B, 32), jnp.float32),
        "w2": 0.1 * jax.random.normal(ks[9], (32, 1), jnp.float32),
        "b2": 0.01 * jax.random.normal(ks[10], (1, 1), jnp.float32),
    }

    packed = jax.tree_util.tree_map(jax.block_until_ready, pack_params(params))

    out = jax.block_until_ready(multimodel_forward(input_values, input_id, mask, packed))
    assert out.shape == (B, 1) and out.dtype == jnp.float32

    # Tight check: reference with the same bf16 rounding / pool-first order as
    # the kernel — verifies the LayerNorm / Linear / tanh head implementation.
    ref_kernel_order = jax.block_until_ready(
        _reference_forward(input_values, params,
                           matmul_dtype=jnp.bfloat16, mean_first=True))
    assert jnp.allclose(out, ref_kernel_order, rtol=2e-3, atol=2e-3), (out, ref_kernel_order)

    # Loose check: exact f32 math in the original per-frame order — the only
    # difference is bf16 rounding of the stand-in HuBERT projection inputs.
    ref_f32 = jax.block_until_ready(_reference_forward(input_values, params))
    assert jnp.allclose(out, ref_f32, rtol=5e-2, atol=5e-2), (out, ref_f32)

    print("KERNEL_OK")
</pallas_src>

<mosaic_0001>
module attributes {stable_mosaic.version = 11 : i64} {
  func.func @_head_kernel(%arg0: memref<4x8x128xf32, #tpu.memory_space<vmem>>, %arg1: memref<128x768xbf16, #tpu.memory_space<vmem>>, %arg2: memref<4x768xf32, #tpu.memory_space<vmem>>, %arg3: memref<768x32xf32, #tpu.memory_space<vmem>>, %arg4: memref<4x32xf32, #tpu.memory_space<vmem>>, %arg5: memref<4x32xf32, #tpu.memory_space<vmem>>, %arg6: memref<4x32xf32, #tpu.memory_space<vmem>>, %arg7: memref<4x32xf32, #tpu.memory_space<vmem>>, %arg8: memref<1x32xf32, #tpu.memory_space<vmem>>, %arg9: memref<1x1xf32, #tpu.memory_space<smem>>, %arg10: memref<4x1xf32, #tpu.memory_space<vmem>>) attributes {dimension_semantics = [], scalar_prefetch = 0 : i64, scratch_operands = 0 : i64, tpu.core_type = #tpu.core_type<tc>} {
    %c0 = arith.constant 0 : index
    %c0_0 = arith.constant 0 : index
    %c0_1 = arith.constant 0 : index
    %0 = vector.load %arg0[%c0, %c0_0, %c0_1] : memref<4x8x128xf32, #tpu.memory_space<vmem>>, vector<4x8x128xf32>
    %cst = arith.constant dense<0.000000e+00> : vector<4x128xf32>
    %1 = vector.multi_reduction <add>, %0, %cst [1] : vector<4x8x128xf32> to vector<4x128xf32>
    %cst_2 = arith.constant 8.000000e+00 : f32
    %2 = vector.broadcast %cst_2 : f32 to vector<4x128xf32>
    %3 = arith.divf %1, %2 : vector<4x128xf32>
    %4 = arith.truncf %3 : vector<4x128xf32> to vector<4x128xbf16>
    %c0_3 = arith.constant 0 : index
    %c0_4 = arith.constant 0 : index
    %5 = vector.load %arg1[%c0_3, %c0_4] : memref<128x768xbf16, #tpu.memory_space<vmem>>, vector<128x768xbf16>
    %cst_5 = arith.constant dense<0.000000e+00> : vector<4x768xf32>
    %6 = tpu.matmul %4, %5, %cst_5 {dimension_numbers = #tpu.dot_dimension_numbers<[1], [0], [0], [1], [0, 0, 1, 1], [], []>} : vector<4x128xbf16>, vector<128x768xbf16>, vector<4x768xf32> -> vector<4x768xf32>
    %7 = vector.shape_cast %6 : vector<4x768xf32> to vector<1x4x768xf32>
    %cst_6 = arith.constant dense<0.000000e+00> : vector<1xf32>
    %8 = vector.multi_reduction <add>, %7, %cst_6 [1, 2] : vector<1x4x768xf32> to vector<1xf32>
    %9 = vector.shape_cast %8 : vector<1xf32> to vector<1x1x1xf32>
    %10 = vector.extract %9[0, 0, 0] : f32 from vector<1x1x1xf32>
    %cst_7 = arith.constant 6.144000e+03 : f32
    %11 = arith.divf %10, %cst_7 : f32
    %12 = vector.broadcast %11 : f32 to vector<4x768xf32>
    %13 = arith.subf %6, %12 : vector<4x768xf32>
    %14 = arith.mulf %13, %13 : vector<4x768xf32>
    %15 = vector.shape_cast %14 : vector<4x768xf32> to vector<1x4x768xf32>
    %cst_8 = arith.constant dense<0.000000e+00> : vector<1xf32>
    %16 = vector.multi_reduction <add>, %15, %cst_8 [1, 2] : vector<1x4x768xf32> to vector<1xf32>
    %17 = vector.shape_cast %16 : vector<1xf32> to vector<1x1x1xf32>
    %18 = vector.extract %17[0, 0, 0] : f32 from vector<1x1x1xf32>
    %cst_9 = arith.constant 3.072000e+03 : f32
    %19 = arith.mulf %cst_9, %11 : f32
    %20 = arith.mulf %19, %11 : f32
    %21 = arith.addf %18, %20 : f32
    %cst_10 = arith.constant 6.144000e+03 : f32
    %22 = arith.divf %21, %cst_10 : f32
    %cst_11 = arith.constant 9.99999974E-6 : f32
    %23 = arith.addf %22, %cst_11 : f32
    %24 = math.rsqrt %23 : f32
    %c0_12 = arith.constant 0 : index
    %c0_13 = arith.constant 0 : index
    %25 = vector.load %arg2[%c0_12, %c0_13] : memref<4x768xf32, #tpu.memory_space<vmem>>, vector<4x768xf32>
    %26 = arith.mulf %6, %25 : vector<4x768xf32>
    %c0_14 = arith.constant 0 : index
    %c0_15 = arith.constant 0 : index
    %27 = vector.load %arg3[%c0_14, %c0_15] : memref<768x32xf32, #tpu.memory_space<vmem>>, vector<768x32xf32>
    %cst_16 = arith.constant dense<0.000000e+00> : vector<4x32xf32>
    %28 = tpu.matmul %26, %27, %cst_16 {dimension_numbers = #tpu.dot_dimension_numbers<[1], [0], [0], [1], [0, 0, 1, 1], [], []>} : vector<4x768xf32>, vector<768x32xf32>, vector<4x32xf32> -> vector<4x32xf32>
    %29 = vector.broadcast %24 : f32 to vector<4x32xf32>
    %30 = arith.mulf %29, %28 : vector<4x32xf32>
    %31 = arith.mulf %11, %24 : f32
    %c0_17 = arith.constant 0 : index
    %c0_18 = arith.constant 0 : index
    %32 = vector.load %arg4[%c0_17, %c0_18] : memref<4x32xf32, #tpu.memory_space<vmem>>, vector<4x32xf32>
    %33 = vector.broadcast %31 : f32 to vector<4x32xf32>
    %34 = arith.mulf %33, %32 : vector<4x32xf32>
    %35 = arith.subf %30, %34 : vector<4x32xf32>
    %c0_19 = arith.constant 0 : index
    %c0_20 = arith.constant 0 : index
    %36 = vector.load %arg5[%c0_19, %c0_20] : memref<4x32xf32, #tpu.memory_space<vmem>>, vector<4x32xf32>
    %37 = arith.addf %35, %36 : vector<4x32xf32>
    %cst_21 = arith.constant 0.000000e+00 : f32
    %38 = vector.broadcast %cst_21 : f32 to vector<4x32xf32>
    %39 = arith.maximumf %37, %38 : vector<4x32xf32>
    %40 = vector.shape_cast %39 : vector<4x32xf32> to vector<1x4x32xf32>
    %cst_22 = arith.constant dense<0.000000e+00> : vector<1xf32>
    %41 = vector.multi_reduction <add>, %40, %cst_22 [1, 2] : vector<1x4x32xf32> to vector<1xf32>
    %42 = vector.shape_cast %41 : vector<1xf32> to vector<1x1x1xf32>
    %43 = vector.extract %42[0, 0, 0] : f32 from vector<1x1x1xf32>
    %cst_23 = arith.constant 1.280000e+02 : f32
    %44 = arith.divf %43, %cst_23 : f32
    %45 = vector.broadcast %44 : f32 to vector<4x32xf32>
    %46 = arith.subf %39, %45 : vector<4x32xf32>
    %47 = arith.mulf %46, %46 : vector<4x32xf32>
    %48 = vector.shape_cast %47 : vector<4x32xf32> to vector<1x4x32xf32>
    %cst_24 = arith.constant dense<0.000000e+00> : vector<1xf32>
    %49 = vector.multi_reduction <add>, %48, %cst_24 [1, 2] : vector<1x4x32xf32> to vector<1xf32>
    %50 = vector.shape_cast %49 : vector<1xf32> to vector<1x1x1xf32>
    %51 = vector.extract %50[0, 0, 0] : f32 from vector<1x1x1xf32>
    %cst_25 = arith.constant 1.280000e+02 : f32
    %52 = arith.divf %51, %cst_25 : f32
    %cst_26 = arith.constant 9.99999974E-6 : f32
    %53 = arith.addf %52, %cst_26 : f32
    %54 = math.rsqrt %53 : f32
    %55 = vector.broadcast %54 : f32 to vector<4x32xf32>
    %56 = arith.mulf %46, %55 : vector<4x32xf32>
    %c0_27 = arith.constant 0 : index
    %c0_28 = arith.constant 0 : index
    %57 = vector.load %arg6[%c0_27, %c0_28] : memref<4x32xf32, #tpu.memory_space<vmem>>, vector<4x32xf32>
    %58 = arith.mulf %56, %57 : vector<4x32xf32>
    %c0_29 = arith.constant 0 : index
    %c0_30 = arith.constant 0 : index
    %59 = vector.load %arg7[%c0_29, %c0_30] : memref<4x32xf32, #tpu.memory_space<vmem>>, vector<4x32xf32>
    %60 = arith.addf %58, %59 : vector<4x32xf32>
    %c0_31 = arith.constant 0 : index
    %c0_32 = arith.constant 0 : index
    %61 = vector.load %arg8[%c0_31, %c0_32] : memref<1x32xf32, #tpu.memory_space<vmem>>, vector<1x32xf32>
    %62 = vector.broadcast %61 : vector<1x32xf32> to vector<4x32xf32>
    %63 = arith.mulf %60, %62 : vector<4x32xf32>
    %cst_33 = arith.constant dense<0.000000e+00> : vector<4xf32>
    %64 = vector.multi_reduction <add>, %63, %cst_33 [1] : vector<4x32xf32> to vector<4xf32>
    %65 = vector.shape_cast %64 : vector<4xf32> to vector<4x1xf32>
    %c0_34 = arith.constant 0 : index
    %c0_35 = arith.constant 0 : index
    %66 = memref.load %arg9[%c0_34, %c0_35] : memref<1x1xf32, #tpu.memory_space<smem>>
    %67 = vector.broadcast %66 : f32 to vector<4x1xf32>
    %68 = arith.addf %65, %67 : vector<4x1xf32>
    %69 = math.tanh %68 : vector<4x1xf32>
    %cst_36 = arith.constant 2.500000e+00 : f32
    %70 = vector.broadcast %cst_36 : f32 to vector<4x1xf32>
    %71 = arith.mulf %69, %70 : vector<4x1xf32>
    %c0_37 = arith.constant 0 : index
    %c0_38 = arith.constant 0 : index
    %72 = vector.load %arg10[%c0_37, %c0_38] : memref<4x1xf32, #tpu.memory_space<vmem>>, vector<4x1xf32>
    tpu.vector_store %arg10[%c0_37, %c0_38], %71 {strides = array<i32>} : memref<4x1xf32, #tpu.memory_space<vmem>>, vector<4x1xf32>,
    return
  }
}

</mosaic_0001>

<bundles_post_ra>
// kernel: multimodel_forward.1
= control target key start
LH: loop header
LB: loop body
LE: loop exit
PB: predicated region body
PF: predicated region fallthrough
CT: control target
= control target key end

     0   :  { %v1212_v1 = vmov 0   ;;  %vm130_vm0 = vcmask 1041409   ;;  %vm132_vm1 = vcmask 1042434   ;;  %vm134_vm2 = vcmask 1043459   ;;  %s1791_s1 = inlined_call_operand.vmem [shape: bf16[128,768], index: 1, kind: input, shape index: {}]   ;;  %s1792_s0 = inlined_call_operand.vmem [shape: f32[4,8,128], index: 0, kind: input, shape index: {}]   ;;  %s1793_s3 = inlined_call_operand.vmem [shape: f32[768,32], index: 3, kind: input, shape index: {}]   ;;  %s1794_s2 = inlined_call_operand.vmem [shape: f32[4,768], index: 2, kind: input, shape index: {}]   ;;  %s1795_s4 = inlined_call_operand.vmem [shape: f32[4,32], index: 4, kind: input, shape index: {}]   ;;  %s1796_s5 = inlined_call_operand.vmem [shape: f32[4,32], index: 5, kind: input, shape index: {}]   ;;  %s1797_s6 = inlined_call_operand.vmem [shape: f32[4,32], index: 6, kind: input, shape index: {}]   ;;  %s1798_s7 = inlined_call_operand.vmem [shape: f32[4,32], index: 7, kind: input, shape index: {}]   ;;  %s1799_s8 = inlined_call_operand.vmem [shape: f32[1,32], index: 8, kind: input, shape index: {}]   ;;  %s1800_s9 = inlined_call_operand.<no memory space> [shape: f32[1,1], index: 9, kind: input, shape index: {}]   ;;  %s1801_s10 = inlined_call_operand.vmem [shape: f32[4,1], index: 10, kind: output, shape index: {}]  }
   0x1   :  { %v1131_v0 = vld [vmem:[%s1791_s1 + $0x154] ss:$24 sps:$4 sm:$0xff]   ;;  %410 = vmatprep.mubr.bf16.mxu0 %v1212_v1  ;;  %451 = vmatprep.mubr.bf16.mxu1 %v1212_v1  ;;  %v1135_v3 = vld [vmem:[%s1791_s1 + $0x150] ss:$24 sps:$4 sm:$0xff]   ;;  %v1137_v5 = vld [vmem:[%s1791_s1 + $0x124] ss:$24 sps:$4 sm:$0xff]  }
   0x2   :  { %v1133_v2 = vld [vmem:[%s1791_s1 + $0x15c] ss:$24 sps:$4 sm:$0xff]   ;;  %378 = vmatprep.subr.bf16.mxu0 %v1131_v0  ;;  %v1136_v4 = vld [vmem:[%s1791_s1 + $0x158] ss:$24 sps:$4 sm:$0xff]   ;;  %v1139_v6 = vld [vmem:[%s1791_s1 + $0x12c] ss:$24 sps:$4 sm:$0xff]  }
   0x3   :  { %419 = vmatprep.subr.bf16.mxu1 %v1133_v2  ;;  %379 = vmatpush1.bf16.msra.mxu0 %v1135_v3  ;;  %v1141_v7 = vld [vmem:[%s1791_s1 + $0x120] ss:$24 sps:$4 sm:$0xff]   ;;  %v1143_v9 = vld [vmem:[%s1791_s1 + $0xf4] ss:$24 sps:$4 sm:$0xff]   ;;  %v1147_v11 = vld [vmem:[%s1791_s1 + $0xf0] ss:$24 sps:$4 sm:$0xff]  }
   0x4   :  { %420 = vmatpush1.bf16.msra.mxu1 %v1136_v4  ;;  %380 = vmatprep.subr.bf16.mxu0 %v1137_v5  ;;  %v1142_v8 = vld [vmem:[%s1791_s1 + $0x128] ss:$24 sps:$4 sm:$0xff]   ;;  %v1145_v10 = vld [vmem:[%s1791_s1 + $0xfc] ss:$24 sps:$4 sm:$0xff]   ;;  %v1148_v12 = vld [vmem:[%s1791_s1 + $0xf8] ss:$24 sps:$4 sm:$0xff]  }
   0x5   :  { %421 = vmatprep.subr.bf16.mxu1 %v1139_v6  ;;  %v1149_v13 = vld [vmem:[%s1791_s1 + $0xc4] ss:$24 sps:$4 sm:$0xff]   ;;  %v1153_v15 = vld [vmem:[%s1791_s1 + $0xc0] ss:$24 sps:$4 sm:$0xff]   ;;  %v1155_v17 = vld [vmem:[%s1791_s1 + $0x94] ss:$24 sps:$4 sm:$0xff]  }
   0x6   :  { %v1151_v14 = vld [vmem:[%s1791_s1 + $0xcc] ss:$24 sps:$4 sm:$0xff]   ;;  %v1154_v16 = vld [vmem:[%s1791_s1 + $0xc8] ss:$24 sps:$4 sm:$0xff]   ;;  %v1157_v18 = vld [vmem:[%s1791_s1 + $0x9c] ss:$24 sps:$4 sm:$0xff]  }
   0x7   :  { %381 = vmatpush1.bf16.msra.mxu0 %v1141_v7  ;;  %v1159_v19 = vld [vmem:[%s1791_s1 + $0x90] ss:$24 sps:$4 sm:$0xff]   ;;  %v1161_v21 = vld [vmem:[%s1791_s1 + $0x64] ss:$24 sps:$4 sm:$0xff]   ;;  %v1165_v23 = vld [vmem:[%s1791_s1 + $0x60] ss:$24 sps:$4 sm:$0xff]  }
   0x8   :  { %422 = vmatpush1.bf16.msra.mxu1 %v1142_v8  ;;  %382 = vmatprep.subr.bf16.mxu0 %v1143_v9  ;;  %v1160_v20 = vld [vmem:[%s1791_s1 + $0x98] ss:$24 sps:$4 sm:$0xff]   ;;  %v1163_v22 = vld [vmem:[%s1791_s1 + $0x6c] ss:$24 sps:$4 sm:$0xff]   ;;  %v1166_v24 = vld [vmem:[%s1791_s1 + $0x68] ss:$24 sps:$4 sm:$0xff]  }
   0x9   :  { %423 = vmatprep.subr.bf16.mxu1 %v1145_v10  ;;  %v1167_v25 = vld [vmem:[%s1791_s1 + $0x34] ss:$24 sps:$4 sm:$0xff]   ;;  %v37_v27 = vld [vmem:[%s1792_s0] sm:$0xff]  ;;  %v40_v30 = vld [vmem:[%s1792_s0 + $0x18] sm:$0xff]  ;;  %vm501_vm3 = vcmask 1043456   ;;  %vm902_vm4 = vcmask 257024  }
   0xa   :  { %v1169_v26 = vld [vmem:[%s1791_s1 + $0x3c] ss:$24 sps:$4 sm:$0xff]   ;;  %v38_v28 = vld [vmem:[%s1792_s0 + $0x8] sm:$0xff]  ;;  %v41_v31 = vrot.slane %v37_v27, 4  ;;  %v59_v35 = vrot.slane %v40_v30, 4  ;;  %vm958_vm5 = vcmask 3072  }
   0xb   :  { %383 = vmatpush1.bf16.msra.mxu0 %v1147_v11  ;;  %v39_v29 = vld [vmem:[%s1792_s0 + $0x10] sm:$0xff]  ;;  %v47_v32 = vrot.slane %v38_v28, 4  ;;  %v1173_v37 = vld [vmem:[%s1791_s1 + $0x4] ss:$24 sps:$4 sm:$0xff]   ;;  %v1177_v45 = vld [vmem:[%s1791_s1] ss:$24 sps:$4 sm:$0xff]  }
   0xc   :  { %424 = vmatpush1.bf16.msra.mxu1 %v1148_v12  ;;  %384 = vmatprep.subr.bf16.mxu0 %v1149_v13  ;;  %v1171_v33 = vld [vmem:[%s1791_s1 + $0x30] ss:$24 sps:$4 sm:$0xff]   ;;  %v53_v34 = vrot.slane %v39_v29, 4  ;;  %v42_v38 = vadd.f32 %v41_v31, %v37_v27  ;;  %v1175_v40 = vld [vmem:[%s1791_s1 + $0xc] ss:$24 sps:$4 sm:$0xff]   ;;  %v60_v42 = vadd.f32 %v59_v35, %v40_v30  ;;  %v617_v62 = vld [vmem:[%s1793_s3 + $0xf8] sm:$0xff] }
   0xd   :  { %425 = vmatprep.subr.bf16.mxu1 %v1151_v14  ;;  %v1172_v36 = vld [vmem:[%s1791_s1 + $0x38] ss:$24 sps:$4 sm:$0xff]   ;;  %v48_v39 = vadd.f32 %v47_v32, %v38_v28  ;;  %v1178_v48 = vld [vmem:[%s1791_s1 + $0x8] ss:$24 sps:$4 sm:$0xff]   ;;  %v1181_v53 = vld [vmem:[%s1791_s1 + $0x164] ss:$24 sps:$4 sm:$0xff]  }
   0xe   :  { %v54_v41 = vadd.f32 %v53_v34, %v39_v29  ;;  %v43_v43 = vrot.slane %v42_v38, 2  ;;  %v61_v47 = vrot.slane %v60_v42, 2  ;;  %v1190_v27 = vld [vmem:[%s1791_s1 + $0xd4] ss:$24 sps:$4 sm:$0xff]   ;;  %v613_v28 = vld [vmem:[%s1793_s3 + $0xd8] sm:$0xff] }
   0xf   :  { %385 = vmatpush1.bf16.msra.mxu0 %v1153_v15  ;;  %v49_v44 = vrot.slane %v48_v39, 2  ;;  %v1179_v15 = vld [vmem:[%s1791_s1 + $0x160] ss:$24 sps:$4 sm:$0xff]   ;;  %v612_v30 = vld [vmem:[%s1793_s3 + $0xd0] sm:$0xff]  ;;  %v611_v34 = vld [vmem:[%s1793_s3 + $0xc8] sm:$0xff] }
  0x10   :  { %426 = vmatpush1.bf16.msra.mxu1 %v1154_v16  ;;  %386 = vmatprep.subr.bf16.mxu0 %v1155_v17  ;;  %v55_v46 = vrot.slane %v54_v41, 2  ;;  %v44_v49 = vadd.f32 %v43_v43, %v42_v38  ;;  %v62_v52 = vadd.f32 %v61_v47, %v60_v42  ;;  %v1184_v17 = vld [vmem:[%s1791_s1 + $0x134] ss:$24 sps:$4 sm:$0xff]   ;;  %v597_v29 = vld [vmem:[%s1793_s3 + $0x58] sm:$0xff]  ;;  %v1188_v31 = vld [vmem:[%s1791_s1 + $0xd0] ss:$24 sps:$4 sm:$0xff]  }
  0x11   :  { %427 = vmatprep.subr.bf16.mxu1 %v1157_v18  ;;  %v50_v50 = vadd.f32 %v49_v44, %v48_v39  ;;  %v601_v18 = vld [vmem:[%s1793_s3 + $0x78] sm:$0xff]  ;;  %v596_v32 = vld [vmem:[%s1793_s3 + $0x50] sm:$0xff]  ;;  %v595_v35 = vld [vmem:[%s1793_s3 + $0x48] sm:$0xff] }
  0x12   :  { %v56_v51 = vadd.f32 %v55_v46, %v54_v41  ;;  %v45_v54 = vrot.slane %v44_v49, 1  ;;  %v63_v57 = vrot.slane %v62_v52, 1  ;;  %v594_v38 = vld [vmem:[%s1793_s3 + $0x40] sm:$0xff]  ;;  %v1196_v39 = vld [vmem:[%s1791_s1 + $0x74] ss:$24 sps:$4 sm:$0xff]   ;;  %v593_v41 = vld [vmem:[%s1793_s3 + $0x38] sm:$0xff] }
  0x13   :  { %387 = vmatpush1.bf16.msra.mxu0 %v1159_v19  ;;  %v51_v55 = vrot.slane %v50_v50, 1  ;;  %v616_v19 = vld [vmem:[%s1793_s3 + $0xf0] sm:$0xff]  ;;  %v607_v46 = vld [vmem:[%s1793_s3 + $0xa8] sm:$0xff] }
  0x14   :  { %428 = vmatpush1.bf16.msra.mxu1 %v1160_v20  ;;  %388 = vmatprep.subr.bf16.mxu0 %v1161_v21  ;;  %v57_v56 = vrot.slane %v56_v51, 1  ;;  %v46_v58 = vadd.f32 %v45_v54, %v44_v49  ;;  %v64_v61 = vadd.f32 %v63_v57, %v62_v52  ;;  %v1182_v20 = vld [vmem:[%s1791_s1 + $0x130] ss:$24 sps:$4 sm:$0xff]   ;;  %v1197_v49 = vld [vmem:[%s1791_s1 + $0x40] ss:$24 sps:$4 sm:$0xff]  }
  0x15   :  { %429 = vmatprep.subr.bf16.mxu1 %v1163_v22  ;;  %v52_v59 = vadd.f32 %v51_v55, %v50_v50  ;;  %v600_v21 = vld [vmem:[%s1793_s3 + $0x70] sm:$0xff]  ;;  %v1187_v22 = vld [vmem:[%s1791_s1 + $0x104] ss:$24 sps:$4 sm:$0xff]   ;;  %v591_v47 = vld [vmem:[%s1793_s3 + $0x28] sm:$0xff] }
  0x16   :  { %v58_v60 = vadd.f32 %v57_v56, %v56_v51  ;;  %v66_v63 = vmul.f32 0.125, %v46_v58  ;;  %v69_v3 = vmul.f32 0.125, %v64_v61  ;;  %v608_v42 = vld [vmem:[%s1793_s3 + $0xb0] sm:$0xff]  ;;  %v590_v50 = vld [vmem:[%s1793_s3 + $0x20] sm:$0xff]  ;;  %v605_v52 = vld [vmem:[%s1793_s3 + $0x98] sm:$0xff] }
  0x17   :  { %389 = vmatpush1.bf16.msra.mxu0 %v1165_v23  ;;  %v67_v0 = vmul.f32 0.125, %v52_v59  ;;  %v615_v23 = vld [vmem:[%s1793_s3 + $0xe8] sm:$0xff]  ;;  %v592_v44 = vld [vmem:[%s1793_s3 + $0x30] sm:$0xff]  ;;  %v649_v55 = vld [vmem:[%s1793_s3 + $0x1f8] sm:$0xff] }
  0x18   :  { %430 = vmatpush1.bf16.msra.mxu1 %v1166_v24  ;;  %390 = vmatprep.subr.bf16.mxu0 %v1167_v25  ;;  %v68_v2 = vmul.f32 0.125, %v58_v60  ;;  %v70_v4 = vpack.c.bf16 %v66_v63, %v66_v63  ;;  %v73_v7 = vpack.c.bf16 %v69_v3, %v69_v3  ;;  %v599_v24 = vld [vmem:[%s1793_s3 + $0x68] sm:$0xff]  ;;  %v1185_v25 = vld [vmem:[%s1791_s1 + $0x100] ss:$24 sps:$4 sm:$0xff]   ;;  %v648_v57 = vld [vmem:[%s1793_s3 + $0x1f0] sm:$0xff] }
  0x19   :  { %431 = vmatprep.subr.bf16.mxu1 %v1169_v26  ;;  %v71_v5 = vpack.c.bf16 %v67_v0, %v67_v0  ;;  %v598_v26 = vld [vmem:[%s1793_s3 + $0x60] sm:$0xff]  ;;  %v1194_v43 = vld [vmem:[%s1791_s1 + $0x70] ss:$24 sps:$4 sm:$0xff]   ;;  %v1202_v51 = vld [vmem:[%s1791_s1 + $0x14] ss:$24 sps:$4 sm:$0xff]  }
  0x1a   :  { %v72_v6 = vpack.c.bf16 %v68_v2, %v68_v2  ;;  %v126_v8 = vunpack.c.l.b16 %v70_v4  ;;  %v129_v11 = vunpack.c.l.b16 %v73_v7  ;;  %v1200_v54 = vld [vmem:[%s1791_s1 + $0x10] ss:$24 sps:$4 sm:$0xff]   ;;  %v633_v56 = vld [vmem:[%s1793_s3 + $0x178] sm:$0xff]  ;;  %v646_v61 = vld [vmem:[%s1793_s3 + $0x1e0] sm:$0xff] }
  0x1b   :  { %391 = vmatpush1.bf16.msra.mxu0 %v1171_v33  ;;  %v127_v9 = vunpack.c.l.b16 %v71_v5  ;;  %v1193_v33 = vld [vmem:[%s1791_s1 + $0xa4] ss:$24 sps:$4 sm:$0xff]   ;;  %v632_v58 = vld [vmem:[%s1793_s3 + $0x170] sm:$0xff]  ;;  %v647_v59 = vld [vmem:[%s1793_s3 + $0x1e8] sm:$0xff] }
  0x1c   :  { %432 = vmatpush1.bf16.msra.mxu1 %v1172_v36  ;;  %392 = vmatprep.subr.bf16.mxu0 %v1173_v37  ;;  %v128_v10 = vunpack.c.l.b16 %v72_v6  ;;  %v610_v36 = vld [vmem:[%s1793_s3 + $0xc0] sm:$0xff]  ;;  %v631_v60 = vld [vmem:[%s1793_s3 + $0x168] sm:$0xff]  ;;  %v645_v63 = vld [vmem:[%s1793_s3 + $0x1d8] sm:$0xff] }
  0x1d   :  { %433 = vmatprep.subr.bf16.mxu1 %v1175_v40  ;;  %v131_v12 = vsel %vm130_vm0, %v127_v9, %v126_v8  ;;  %v1191_v37 = vld [vmem:[%s1791_s1 + $0xa0] ss:$24 sps:$4 sm:$0xff]   ;;  %v644_v2 = vld [vmem:[%s1793_s3 + $0x1d0] sm:$0xff]  ;;  %v643_v4 = vld [vmem:[%s1793_s3 + $0x1c8] sm:$0xff] }
  0x1e   :  { %v133_v13 = vsel %vm132_vm1, %v128_v10, %v131_v12  ;;  %v609_v40 = vld [vmem:[%s1793_s3 + $0xb8] sm:$0xff]  ;;  %v628_v3 = vld [vmem:[%s1793_s3 + $0x150] sm:$0xff]  ;;  %v627_v5 = vld [vmem:[%s1793_s3 + $0x148] sm:$0xff] }
  0x1f   :  { %393 = vmatpush1.bf16.msra.mxu0 %v1177_v45  ;;  %v135_v14 = vsel %vm134_vm2, %v129_v11, %v133_v13  ;;  %v1199_v45 = vld [vmem:[%s1791_s1 + $0x44] ss:$24 sps:$4 sm:$0xff]   ;;  %v640_v10 = vld [vmem:[%s1793_s3 + $0x1b0] sm:$0xff]  ;;  %v639_v12 = vld [vmem:[%s1793_s3 + $0x1a8] sm:$0xff] }
  0x20   :  { %434 = vmatpush1.bf16.msra.mxu1 %v1178_v48  ;;  %460 = vmatprep.subr.bf16.mxu0 %v1181_v53  ;;  %v1387_v16 = vpack.c.b16 %v135_v14, %v135_v14  ;;  %v606_v48 = vld [vmem:[%s1793_s3 + $0xa0] sm:$0xff]  ;;  %v589_v53 = vld [vmem:[%s1793_s3 + $0x18] sm:$0xff]  ;;  %v624_v11 = vld [vmem:[%s1793_s3 + $0x130] sm:$0xff] }
  0x21   :  { %1013 = vmatprep.subr.mxu1 %v617_v62  ;;  %v630_v62 = vld [vmem:[%s1793_s3 + $0x160] sm:$0xff]  ;;  %v629_v0 = vld [vmem:[%s1793_s3 + $0x158] sm:$0xff]  ;;  %v623_v13 = vld [vmem:[%s1793_s3 + $0x128] sm:$0xff] }
  0x22   :  { %411 = vmatmul.mubr.bf16.vlgmr.msra.gmra.mxu0 %v1387_v16  ;;  %v642_v6 = vld [vmem:[%s1793_s3 + $0x1c0] sm:$0xff]  ;;  %v641_v8 = vld [vmem:[%s1793_s3 + $0x1b8] sm:$0xff] }
  0x23   :  { %452 = vmatmul.mubr.bf16.vlgmr.msra.gmra.mxu1 %v1387_v16  ;;  %461 = vmatpush1.bf16.msra.mxu0 %v1179_v15  ;;  %v626_v7 = vld [vmem:[%s1793_s3 + $0x140] sm:$0xff]  ;;  %v625_v9 = vld [vmem:[%s1793_s3 + $0x138] sm:$0xff] }
  0x24   :  { %492 = vmatprep.mubr.bf16.mxu0 %v1212_v1  ;;  %462 = vmatprep.subr.bf16.mxu0 %v1184_v17  ;;  %v614_v1 = vld [vmem:[%s1793_s3 + $0xe0] sm:$0xff]  ;;  %v621_v17 = vld [vmem:[%s1793_s3 + $0x118] sm:$0xff] }
  0x25   :  { %1014 = vmatpush3.msra.mxu1 %v601_v18  ;;  %v638_v14 = vld [vmem:[%s1793_s3 + $0x1a0] sm:$0xff]  ;;  %v604_v18 = vld [vmem:[%s1793_s3 + $0x90] sm:$0xff] }
  0x26   :  { %1015 = vmatprep.subr.mxu1 %v616_v19  ;;  %v622_v15 = vld [vmem:[%s1793_s3 + $0x120] sm:$0xff]  ;;  %v636_v19 = vld [vmem:[%s1793_s3 + $0x190] sm:$0xff] }
  0x27   :  { %1016 = vmatpush3.msra.mxu1 %v600_v21  ;;  %463 = vmatpush1.bf16.msra.mxu0 %v1182_v20  ;;  %v588_v20 = vld [vmem:[%s1793_s3 + $0x10] sm:$0xff] }
  0x28   :  { %1017 = vmatprep.subr.mxu1 %v615_v23  ;;  %464 = vmatprep.subr.bf16.mxu0 %v1187_v22  ;;  %v620_v21 = vld [vmem:[%s1793_s3 + $0x110] sm:$0xff]  ;;  %v603_v22 = vld [vmem:[%s1793_s3 + $0x88] sm:$0xff] }
  0x29   :  { %1018 = vmatpush3.msra.mxu1 %v599_v24  ;;  %v635_v23 = vld [vmem:[%s1793_s3 + $0x188] sm:$0xff] }
  0x2a   :  { %1019 = vmatprep.subr.mxu1 %v614_v1  ;;  %v587_v24 = vld [vmem:[%s1793_s3 + $0x8] sm:$0xff] }
  0x2b   :  { %1020 = vmatpush3.msra.mxu1 %v598_v26  ;;  %465 = vmatpush1.bf16.msra.mxu0 %v1185_v25  ;;  %v619_v1 = vld [vmem:[%s1793_s3 + $0x108] sm:$0xff]  ;;  %v602_v25 = vld [vmem:[%s1793_s3 + $0x80] sm:$0xff] }
  0x2c   :  { %1021 = vmatprep.subr.mxu1 %v613_v28  ;;  %466 = vmatprep.subr.bf16.mxu0 %v1190_v27  ;;  %v634_v26 = vld [vmem:[%s1793_s3 + $0x180] sm:$0xff] }
  0x2d   :  { %1022 = vmatpush3.msra.mxu1 %v597_v29  ;;  %v586_v27 = vld [vmem:[%s1793_s3] sm:$0xff]  ;;  %v681_v29 = vld [vmem:[%s1793_s3 + $0x2f8] sm:$0xff] }
  0x2e   :  { %1023 = vmatprep.subr.mxu1 %v612_v30  ;;  %v618_v28 = vld [vmem:[%s1793_s3 + $0x100] sm:$0xff] }
  0x2f   :  { %1024 = vmatpush3.msra.mxu1 %v596_v32  ;;  %467 = vmatpush1.bf16.msra.mxu0 %v1188_v31  ;;  %v568_v30 = vld [vmem:[%s1794_s2] sm:$0xff]  ;;  %v569_v31 = vld [vmem:[%s1794_s2 + $0x8] sm:$0xff] }
  0x30   :  { %1025 = vmatprep.subr.mxu1 %v611_v34  ;;  %468 = vmatprep.subr.bf16.mxu0 %v1193_v33  ;;  %v574_v32 = vcombine.high %v568_v30, %v568_v30  ;;  %v575_v33 = vcombine.high %v569_v31, %v569_v31 }
  0x31   :  { %1026 = vmatpush3.msra.mxu1 %v595_v35 }
  0x32   :  { %1027 = vmatprep.subr.mxu1 %v610_v36 }
  0x33   :  { %1028 = vmatpush3.msra.mxu1 %v594_v38  ;;  %469 = vmatpush1.bf16.msra.mxu0 %v1191_v37 }
  0x34   :  { %1029 = vmatprep.subr.mxu1 %v609_v40  ;;  %470 = vmatprep.subr.bf16.mxu0 %v1196_v39 }
  0x35   :  { %1030 = vmatpush3.msra.mxu1 %v593_v41 }
  0x36   :  { %1031 = vmatprep.subr.mxu1 %v608_v42 }
  0x37   :  { %1032 = vmatpush3.msra.mxu1 %v592_v44  ;;  %471 = vmatpush1.bf16.msra.mxu0 %v1194_v43  ;;  %v665_v43 = vld [vmem:[%s1793_s3 + $0x278] sm:$0xff] }
  0x38   :  { %1033 = vmatprep.subr.mxu1 %v607_v46  ;;  %472 = vmatprep.subr.bf16.mxu0 %v1199_v45  ;;  %v680_v45 = vld [vmem:[%s1793_s3 + $0x2f0] sm:$0xff] }
  0x39   :  { %1034 = vmatpush3.msra.mxu1 %v591_v47  ;;  %v664_v47 = vld [vmem:[%s1793_s3 + $0x270] sm:$0xff] }
  0x3a   :  { %1035 = vmatprep.subr.mxu1 %v606_v48 }
  0x3b   :  { %1036 = vmatpush3.msra.mxu1 %v590_v50  ;;  %473 = vmatpush1.bf16.msra.mxu0 %v1197_v49  ;;  %v679_v49 = vld [vmem:[%s1793_s3 + $0x2e8] sm:$0xff] }
  0x3c   :  { %1037 = vmatprep.subr.mxu1 %v605_v52  ;;  %474 = vmatprep.subr.bf16.mxu0 %v1202_v51  ;;  %v663_v50 = vld [vmem:[%s1793_s3 + $0x268] sm:$0xff]  ;;  %v678_v51 = vld [vmem:[%s1793_s3 + $0x2e0] sm:$0xff] }
  0x3d   :  { %1038 = vmatpush3.msra.mxu1 %v589_v53  ;;  %v662_v52 = vld [vmem:[%s1793_s3 + $0x260] sm:$0xff]  ;;  %v677_v53 = vld [vmem:[%s1793_s3 + $0x2d8] sm:$0xff] }
  0x3e   :  { %1039 = vmatprep.subr.mxu1 %v604_v18  ;;  %v667_v18 = vld [vmem:[%s1793_s3 + $0x288] sm:$0xff] }
  0x3f   :  { %475 = vmatpush1.bf16.msra.mxu0 %v1200_v54  ;;  %1040 = vmatpush3.msra.mxu1 %v588_v20  ;;  %v661_v54 = vld [vmem:[%s1793_s3 + $0x258] sm:$0xff]  ;;  %v651_v20 = vld [vmem:[%s1793_s3 + $0x208] sm:$0xff] }
  0x40   :  { %1048 = vmatprep.subr.mxu0 %v649_v55  ;;  %1041 = vmatprep.subr.mxu1 %v603_v22  ;;  %v676_v55 = vld [vmem:[%s1793_s3 + $0x2d0] sm:$0xff]  ;;  %v666_v22 = vld [vmem:[%s1793_s3 + $0x280] sm:$0xff] }
  0x41   :  { %1042 = vmatpush3.msra.mxu1 %v587_v24 }
  0x42   :  { %493 = vmatmul.mubr.bf16.vlgmr.msra.gmra.mxu0 %v1387_v16  ;;  %v637_v16 = vld [vmem:[%s1793_s3 + $0x198] sm:$0xff]  ;;  %1043 = vmatprep.subr.mxu1 %v602_v25 }
  0x43   :  { %1049 = vmatpush3.msra.mxu0 %v633_v56  ;;  %1044 = vmatpush3.msra.mxu1 %v586_v27  ;;  %v660_v56 = vld [vmem:[%s1793_s3 + $0x250] sm:$0xff] }
  0x44   :  { %1050 = vmatprep.subr.mxu0 %v648_v57  ;;  %1083 = vmatprep.subr.mxu1 %v681_v29  ;;  %v675_v57 = vld [vmem:[%s1793_s3 + $0x2c8] sm:$0xff] }
  0x45   :  { %1051 = vmatpush3.msra.mxu0 %v632_v58  ;;  %v659_v58 = vld [vmem:[%s1793_s3 + $0x248] sm:$0xff] }
  0x46   :  { %1052 = vmatprep.subr.mxu0 %v647_v59  ;;  %v674_v59 = vld [vmem:[%s1793_s3 + $0x2c0] sm:$0xff] }
  0x47   :  { %1053 = vmatpush3.msra.mxu0 %v631_v60  ;;  %v658_v60 = vld [vmem:[%s1793_s3 + $0x240] sm:$0xff] }
  0x48   :  { %1054 = vmatprep.subr.mxu0 %v646_v61  ;;  %v673_v61 = vld [vmem:[%s1793_s3 + $0x2b8] sm:$0xff] }
  0x49   :  { %1055 = vmatpush3.msra.mxu0 %v630_v62  ;;  %v657_v62 = vld [vmem:[%s1793_s3 + $0x238] sm:$0xff] }
  0x4a   :  { %1056 = vmatprep.subr.mxu0 %v645_v63 }
  0x4b   :  { %1057 = vmatpush3.msra.mxu0 %v629_v0 }
  0x4c   :  { %1058 = vmatprep.subr.mxu0 %v644_v2  ;;  %v672_v2 = vld [vmem:[%s1793_s3 + $0x2b0] sm:$0xff] }
  0x4d   :  { %1059 = vmatpush3.msra.mxu0 %v628_v3  ;;  %v656_v3 = vld [vmem:[%s1793_s3 + $0x230] sm:$0xff] }
  0x4e   :  { %1060 = vmatprep.subr.mxu0 %v643_v4  ;;  %v671_v4 = vld [vmem:[%s1793_s3 + $0x2a8] sm:$0xff] }
  0x4f   :  { %1061 = vmatpush3.msra.mxu0 %v627_v5 }
  0x50   :  { %1062 = vmatprep.subr.mxu0 %v642_v6  ;;  %v655_v6 = vld [vmem:[%s1793_s3 + $0x228] sm:$0xff] }
  0x51   :  { %1063 = vmatpush3.msra.mxu0 %v626_v7 }
  0x52   :  { %1064 = vmatprep.subr.mxu0 %v641_v8  ;;  %v670_v8 = vld [vmem:[%s1793_s3 + $0x2a0] sm:$0xff] }
  0x53   :  { %1065 = vmatpush3.msra.mxu0 %v625_v9  ;;  %v654_v9 = vld [vmem:[%s1793_s3 + $0x220] sm:$0xff] }
  0x54   :  { %1066 = vmatprep.subr.mxu0 %v640_v10  ;;  %v669_v10 = vld [vmem:[%s1793_s3 + $0x298] sm:$0xff] }
  0x55   :  { %1067 = vmatpush3.msra.mxu0 %v624_v11  ;;  %v653_v11 = vld [vmem:[%s1793_s3 + $0x218] sm:$0xff] }
  0x56   :  { %1068 = vmatprep.subr.mxu0 %v639_v12  ;;  %v570_v12 = vld [vmem:[%s1794_s2 + $0x10] sm:$0xff] }
  0x57   :  { %1069 = vmatpush3.msra.mxu0 %v623_v13 }
  0x58   :  { %1070 = vmatprep.subr.mxu0 %v638_v14 }
  0x59   :  { %1071 = vmatpush3.msra.mxu0 %v622_v15  ;;  %v668_v15 = vld [vmem:[%s1793_s3 + $0x290] sm:$0xff] }
  0x5a   :  { %1072 = vmatprep.subr.mxu0 %v637_v16  ;;  %v652_v16 = vld [vmem:[%s1793_s3 + $0x210] sm:$0xff] }
  0x5b   :  { %1073 = vmatpush3.msra.mxu0 %v621_v17  ;;  %v576_v17 = vcombine.high %v570_v12, %v570_v12 }
  0x5c   :  { %1074 = vmatprep.subr.mxu0 %v636_v19 }
  0x5d   :  { %1075 = vmatpush3.msra.mxu0 %v620_v21 }
  0x5e   :  { %1076 = vmatprep.subr.mxu0 %v635_v23 }
  0x5f   :  { %1077 = vmatpush3.msra.mxu0 %v619_v1  ;;  %v650_v1 = vld [vmem:[%s1793_s3 + $0x200] sm:$0xff] }
  0x60   :  { %1078 = vmatprep.subr.mxu0 %v634_v26 }
  0x61   :  { %1079 = vmatpush3.msra.mxu0 %v618_v28 }
  0xe2   :  { %v1633_v34 = vpop.f32.mrf.mxu0 }
  0xe3   :  { %v1635_v35 = vpop.f32.mrf.mxu1  ;;  %v580_v41 = vmul.f32 %v568_v30, %v1633_v34  ;;  %v502_v63 = vsel %vm501_vm3, %v1633_v34, 0.0 }
  0xe4   :  { %v582_v36 = vmul.f32 %v569_v31, %v1635_v35  ;;  %v1638_v37 = vpop.f32.mrf.mxu0  ;;  %v505_v7 = vsel %vm501_vm3, %v1635_v35, 0.0 }
  0xe5   :  { %v1640_v38 = vpop.f32.mrf.mxu1  ;;  %v581_v39 = vmul.f32 %v574_v32, %v1638_v37  ;;  %v503_v0 = vsel %vm501_vm3, %v1638_v37, 0.0 }
  0xe6   :  { %v583_v40 = vmul.f32 %v575_v33, %v1640_v38  ;;  %v416_v42 = vpop.f32.mrf.mxu0  ;;  %v504_v5 = vadd.f32 %v503_v0, %v502_v63  ;;  %v507_v14 = vsel %vm501_vm3, %v1640_v38, 0.0 }
  0xe7   :  { %v457_v44 = vpop.f32.mrf.mxu1  ;;  %746 = vmatprep.mubr.f32.mxu1 %v581_v39 }
  0xe8   :  { %816 = vmatprep.mubr.f32.mxu0 %v583_v40  ;;  %v417_v46 = vpop.f32.mrf.mxu0  ;;  %747 = vmatmul.mubr.f32.vlgmr.msra.gmra.mxu1 %v580_v41  ;;  %v506_v13 = vadd.f32 %v505_v7, %v504_v5 }
  0xe9   :  { %817 = vmatmul.mubr.f32.vlgmr.msra.gmra.mxu0 %v582_v36  ;;  %v458_v48 = vpop.f32.mrf.mxu1  ;;  %1084 = vmatpush3.msra.mxu1 %v665_v43 }
  0xea   :  { %1085 = vmatprep.subr.mxu1 %v680_v45  ;;  %v508_v21 = vadd.f32 %v507_v14, %v506_v13 }
  0xeb   :  { %1086 = vmatpush3.msra.mxu1 %v664_v47 }
  0xec   :  { %1087 = vmatprep.subr.mxu1 %v679_v49 }
  0xed   :  { %1088 = vmatpush3.msra.mxu1 %v663_v50 }
  0xee   :  { %1089 = vmatprep.subr.mxu1 %v678_v51 }
  0xef   :  { %1090 = vmatpush3.msra.mxu1 %v662_v52 }
  0xf0   :  { %1091 = vmatprep.subr.mxu1 %v677_v53 }
  0xf1   :  { %1092 = vmatpush3.msra.mxu1 %v661_v54 }
  0xf2   :  { %1093 = vmatprep.subr.mxu1 %v676_v55 }
  0xf3   :  { %1094 = vmatpush3.msra.mxu1 %v660_v56 }
  0xf4   :  { %1095 = vmatprep.subr.mxu1 %v675_v57 }
  0xf5   :  { %1096 = vmatpush3.msra.mxu1 %v659_v58 }
  0xf6   :  { %1097 = vmatprep.subr.mxu1 %v674_v59 }
  0xf7   :  { %1098 = vmatpush3.msra.mxu1 %v658_v60 }
  0xf8   :  { %1099 = vmatprep.subr.mxu1 %v673_v61 }
  0xf9   :  { %1100 = vmatpush3.msra.mxu1 %v657_v62 }
  0xfa   :  { %1101 = vmatprep.subr.mxu1 %v672_v2 }
  0xfb   :  { %1102 = vmatpush3.msra.mxu1 %v656_v3 }
  0xfc   :  { %1103 = vmatprep.subr.mxu1 %v671_v4 }
  0xfd   :  { %1104 = vmatpush3.msra.mxu1 %v655_v6 }
  0xfe   :  { %1105 = vmatprep.subr.mxu1 %v670_v8 }
  0xff   :  { %1106 = vmatpush3.msra.mxu1 %v654_v9 }
 0x100   :  { %1107 = vmatprep.subr.mxu1 %v669_v10 }
 0x101   :  { %1108 = vmatpush3.msra.mxu1 %v653_v11 }
 0x102   :  { %v494_v19 = vpop.f32.mrf.mxu0  ;;  %1109 = vmatprep.subr.mxu1 %v668_v15 }
 0x103   :  { %1110 = vmatpush3.msra.mxu1 %v652_v16  ;;  %v509_v23 = vsel %vm501_vm3, %v494_v19, 0.0  ;;  %v584_v28 = vmul.f32 %v570_v12, %v494_v19 }
 0x104   :  { %v496_v24 = vpop.f32.mrf.mxu0  ;;  %1111 = vmatprep.subr.mxu1 %v667_v18  ;;  %v510_v25 = vadd.f32 %v509_v23, %v508_v21 }
 0x105   :  { %v585_v26 = vmul.f32 %v576_v17, %v496_v24  ;;  %1112 = vmatpush3.msra.mxu1 %v651_v20  ;;  %v511_v27 = vsel %vm501_vm3, %v496_v24, 0.0  ;;  %v895_v20 = vld [vmem:[%s1795_s4] sm:$0xf] }
 0x106   :  { %v498_v29 = vpop.f32.mrf.mxu0  ;;  %1113 = vmatprep.subr.mxu1 %v666_v22  ;;  %v512_v30 = vadd.f32 %v511_v27, %v510_v25 }
 0x107   :  { %1114 = vmatpush3.msra.mxu1 %v650_v1  ;;  %886 = vmatprep.mubr.f32.mxu1 %v585_v26  ;;  %v899_v1 = vld [vmem:[%s1796_s5] sm:$0xf] }
 0x108   :  { %887 = vmatmul.mubr.f32.vlgmr.msra.gmra.mxu1 %v584_v28  ;;  %513 = vadd.xlane.f32.xlu0 %v512_v30  ;;  %v499_v31 = vpop.f32.mrf.mxu0 }
 0x191   :  { %v514_v32 = vpop.xlane.xlu0 %513 }
 0x192   :  { %v515_v33 = vrot.slane %v514_v32, 4 }
 0x194   :  { %v516_v36 = vadd.f32 %v515_v33, %v514_v32 }
 0x196   :  { %v517_v39 = vrot.slane %v516_v36, 2 }
 0x198   :  { %v518_v40 = vadd.f32 %v517_v39, %v516_v36 }
 0x19a   :  { %v519_v41 = vrot.slane %v518_v40, 1 }
 0x19c   :  { %v520_v42 = vadd.f32 %v519_v41, %v518_v40 }
 0x19e   :  { %1118 = vpush %v520_v42 }
 0x1a8   :  { %v1045_v9 = vpop.f32.mrf.mxu1 }
 0x1a9   :  { %v1080_v10 = vpop.f32.mrf.mxu0 }
 0x1aa   :  { %v1046_v11 = vpop.f32.mrf.mxu1 }
 0x1ab   :  { %v1081_v13 = vpop.f32.mrf.mxu0  ;;  %v1047_v15 = vadd.f32 %v1046_v11, %v1045_v9 }
 0x1ac   :  { %v1082_v16 = vadd.f32 %v1081_v13, %v1080_v10 }
 0x1ae   :  { %v819_v18 = vadd.f32 %v1082_v16, %v1047_v15 }
 0x1c8   :  { %v1115_v12 = vpop.f32.mrf.mxu1 }
 0x1ca   :  { %v1116_v14 = vpop.f32.mrf.mxu1 }
 0x1cb   :  { %v1117_v17 = vadd.f32 %v1116_v14, %v1115_v12 }
 0x1cd   :  { %v889_v21 = vadd.f32 %v1117_v17, %v819_v18 }
 0x1cf   :  { %s1119_s3 = spop %1118 }
 0x1d0   :  { %s1751_s16 = smul.f32 0.00016276042, %s1119_s3 }
 0x1d2   :  { %v525_v43 = vstv %s1751_s16  ;;  %s558_s17 = smul.f32 3072.0, %s1751_s16 }
 0x1d3   :  { %v526_v44 = vsub.f32 %v1633_v34, %v525_v43  ;;  %v527_v45 = vsub.f32 %v1638_v37, %v525_v43  ;;  %v528_v46 = vsub.f32 %v1635_v35, %v525_v43  ;;  %v529_v47 = vsub.f32 %v1640_v38, %v525_v43 }
 0x1d4   :  { %v530_v48 = vsub.f32 %v494_v19, %v525_v43  ;;  %v531_v52 = vsub.f32 %v496_v24, %v525_v43  ;;  %s559_s18 = smul.f32 %s558_s17, %s1751_s16 }
 0x1d5   :  { %v532_v49 = vmul.f32 %v526_v44, %v526_v44  ;;  %v533_v50 = vmul.f32 %v527_v45, %v527_v45  ;;  %v534_v51 = vmul.f32 %v528_v46, %v528_v46  ;;  %v535_v53 = vmul.f32 %v529_v47, %v529_v47 }
 0x1d6   :  { %v536_v57 = vmul.f32 %v530_v48, %v530_v48  ;;  %v537_v37 = vmul.f32 %v531_v52, %v531_v52 }
 0x1d7   :  { %v538_v54 = vsel %vm501_vm3, %v532_v49, 0.0  ;;  %v539_v55 = vsel %vm501_vm3, %v533_v50, 0.0  ;;  %v541_v34 = vsel %vm501_vm3, %v534_v51, 0.0  ;;  %v543_v35 = vsel %vm501_vm3, %v535_v53, 0.0 }
 0x1d8   :  { %v540_v56 = vadd.f32 %v539_v55, %v538_v54  ;;  %v545_v59 = vsel %vm501_vm3, %v536_v57, 0.0  ;;  %v547_v61 = vsel %vm501_vm3, %v537_v37, 0.0  ;;  %v938_v54 = vld [vmem:[%s1797_s6] sm:$0xf] }
 0x1da   :  { %v542_v58 = vadd.f32 %v541_v34, %v540_v56  ;;  %v940_v56 = vld [vmem:[%s1798_s7] sm:$0xf] }
 0x1db   :  { %v1012_v34 = vld [vmem:[%s1799_s8] ss:$0 sm:$0xff] }
 0x1dc   :  { %v544_v38 = vadd.f32 %v543_v35, %v542_v58 }
 0x1de   :  { %v546_v60 = vadd.f32 %v545_v59, %v544_v38  ;;  %v954_v38 = vstv %s1800_s9 }
 0x1e0   :  { %v548_v62 = vadd.f32 %v547_v61, %v546_v60 }
 0x1e2   :  { %549 = vadd.xlane.f32.xlu0 %v548_v62 }
 0x26b   :  { %v550_v63 = vpop.xlane.xlu0 %549 }
 0x26c   :  { %v551_v0 = vrot.slane %v550_v63, 4 }
 0x26e   :  { %v552_v2 = vadd.f32 %v551_v0, %v550_v63 }
 0x270   :  { %v553_v3 = vrot.slane %v552_v2, 2 }
 0x272   :  { %v554_v4 = vadd.f32 %v553_v3, %v552_v2 }
 0x274   :  { %v555_v5 = vrot.slane %v554_v4, 1 }
 0x276   :  { %v556_v6 = vadd.f32 %v555_v5, %v554_v4 }
 0x278   :  { %1120 = vpush %v556_v6 }
 0x2a9   :  { %s1121_s0 = spop %1120 }
 0x2aa   :  { %s560_s19 = sadd.f32 %s1121_s0, %s559_s18 }
 0x2ac   :  { %s563_s20 = smul.f32 0.00016276042, %s560_s19 }
 0x2ae   :  { %s564_s21 = sadd.f32 1e-05, %s563_s20 }
 0x2b0   :  { %v565_v7 = vstv %s564_s21 }
 0x2b1   :  { %1206 = vrsqrt.f32 %v565_v7 }
 0x2be   :  { %v1207_v8 = vpop.eup %1206 }
 0x2bf   :  { %1122 = vpush %v1207_v8 }
 0x2f0   :  { %s1123_s22 = spop %1122 }
 0x2f1   :  { %v892_v19 = vstv %s1123_s22  ;;  %s894_s23 = smul.f32 %s1123_s22, %s1751_s16 }
 0x2f2   :  { %v893_v23 = vmul.f32 %v892_v19, %v889_v21 }
 0x2f3   :  { %v896_v22 = vstv %s894_s23 }
 0x2f4   :  { %v897_v24 = vmul.f32 %v896_v22, %v895_v20 }
 0x2f6   :  { %v898_v25 = vsub.f32 %v893_v23, %v897_v24 }
 0x2f8   :  { %v900_v26 = vadd.f32 %v899_v1, %v898_v25 }
 0x2fa   :  { %v901_v27 = vmax.f32 %v900_v26, 0.0 }
 0x2fc   :  { %v903_v28 = vsel %vm902_vm4, %v901_v27, 0.0 }
 0x2fd   :  { %904 = vadd.xlane.f32.xlu1 %v903_v28 }
 0x386   :  { %v905_v29 = vpop.xlane.xlu1 %904 }
 0x387   :  { %v906_v30 = vrot.slane %v905_v29, 4 }
 0x389   :  { %v907_v31 = vadd.f32 %v906_v30, %v905_v29 }
 0x38b   :  { %v908_v32 = vrot.slane %v907_v31, 2 }
 0x38d   :  { %v909_v33 = vadd.f32 %v908_v32, %v907_v31 }
 0x38f   :  { %v910_v36 = vrot.slane %v909_v33, 1 }
 0x391   :  { %v911_v39 = vadd.f32 %v910_v36, %v909_v33 }
 0x393   :  { %1124 = vpush %v911_v39 }
 0x3c4   :  { %s1125_s4 = spop %1124 }
 0x3c5   :  { %s915_s28 = smul.f32 0.0078125, %s1125_s4 }
 0x3c7   :  { %v916_v40 = vstv %s915_s28 }
 0x3c8   :  { %v917_v41 = vsub.f32 %v901_v27, %v916_v40 }
 0x3ca   :  { %v918_v42 = vmul.f32 %v917_v41, %v917_v41 }
 0x3cc   :  { %v919_v43 = vsel %vm902_vm4, %v918_v42, 0.0 }
 0x3cd   :  { %920 = vadd.xlane.f32.xlu1 %v919_v43 }
 0x456   :  { %v921_v44 = vpop.xlane.xlu1 %920 }
 0x457   :  { %v922_v45 = vrot.slane %v921_v44, 4 }
 0x459   :  { %v923_v46 = vadd.f32 %v922_v45, %v921_v44 }
 0x45b   :  { %v924_v47 = vrot.slane %v923_v46, 2 }
 0x45d   :  { %v925_v48 = vadd.f32 %v924_v47, %v923_v46 }
 0x45f   :  { %v926_v49 = vrot.slane %v925_v48, 1 }
 0x461   :  { %v927_v50 = vadd.f32 %v926_v49, %v925_v48 }
 0x463   :  { %1126 = vpush %v927_v50 }
 0x494   :  { %s1127_s5 = spop %1126 }
 0x495   :  { %s931_s29 = smul.f32 0.0078125, %s1127_s5 }
 0x497   :  { %s932_s1 = sadd.f32 1e-05, %s931_s29 }
 0x499   :  { %v933_v51 = vstv %s932_s1 }
 0x49a   :  { %1208 = vrsqrt.f32 %v933_v51 }
 0x4a7   :  { %v1209_v52 = vpop.eup %1208 }
 0x4a8   :  { %1128 = vpush %v1209_v52 }
 0x4d9   :  { %s1129_s30 = spop %1128 }
 0x4da   :  { %v936_v53 = vstv %s1129_s30 }
 0x4db   :  { %v937_v55 = vmul.f32 %v936_v53, %v917_v41 }
 0x4dd   :  { %v939_v57 = vmul.f32 %v938_v54, %v937_v55 }
 0x4df   :  { %v941_v58 = vadd.f32 %v940_v56, %v939_v57 }
 0x4e1   :  { %v949_v37 = vmul.f32 %v1012_v34, %v941_v58 }
 0x4e3   :  { %v950_v35 = vsel %vm902_vm4, %v949_v37, 0.0 }
 0x4e4   :  { %951 = vadd.xlane.f32.xlu0 %v950_v35 }
 0x56d   :  { %v952_v59 = vpop.xlane.xlu0 %951 }
 0x56e   :  { %v955_v60 = vadd.f32 %v954_v38, %v952_v59 }
 0x570   :  { %1210 = vtanh.f32 %v955_v60 }
 0x57d   :  { %v1211_v61 = vpop.eup %1210 }
 0x57e   :  { %v957_v62 = vmul.f32 2.5, %v1211_v61 }
 0x580   :  { %959 = vst.msk [vmem:[%s1801_s10] sm:$0xf] %vm958_vm5, %v957_v62 }

</bundles_post_ra>
